<compile_context>
chip_gen: v6e
topology: v6e:2x2x1
jax: 0.10.0
libtpu: 0.0.40
codegen_flags: <defaults>
</compile_context>

<pallas_src>
import functools

import jax
import jax.numpy as jnp
from jax.experimental import pallas as pl
from jax.experimental.pallas import tpu as pltpu


def _round_up(v, m):
    return ((v + m - 1) // m) * m


def lnp_kernel(x_ref, w1_ref, b1_ref, w2_ref, b2_ref, fr_ref, x0_ref):
    # One batch tile per grid step; weights/biases are VMEM-resident (constant
    # index_map). All last dims are 128-aligned -> unmasked lane-dense stores.
    x = x_ref[...]                                                   # (TB, D)
    # First linear layer: MXU matmul (f32 accumulate) + VPU bias broadcast.
    x0 = jnp.dot(x, w1_ref[...],
                 preferred_element_type=jnp.float32) + b1_ref[...]   # (TB, Hp)
    x0_ref[...] = x0.astype(x0_ref.dtype)
    # Second linear layer + exp (EUP transcendental).
    z = jnp.dot(x0, w2_ref[...],
                preferred_element_type=jnp.float32) + b2_ref[...]    # (TB, Np)
    fr_ref[...] = jnp.exp(z).astype(fr_ref.dtype)


@functools.partial(jax.jit, static_argnames=("block_b",))
def lnp_forward(x, w1, b1, w2, b2, *, block_b=512):
    """Forward pass of LNPModel.

    x : (B, D) f32
    w1: (10, D) f32  (PyTorch nn.Linear layout: (out, in))
    b1: (10,)   f32
    w2: (N, 10) f32
    b2: (N,)    f32
    Returns (firing_rate (B, N), x_0 (B, 10)).
    """
    B, D = x.shape
    H = w1.shape[0]          # hidden = 10
    N = w2.shape[0]          # n_neurons

    LANES = 128
    Hp = _round_up(H, LANES)             # lane-dense hidden width
    Np = _round_up(N, LANES)             # lane-dense output width
    TB = min(block_b, _round_up(B, 8))   # batch tile (sublane-aligned)
    Bp = _round_up(B, TB)                # padded batch

    # Wrapper-side layout plumbing (free XLA ops): pre-transpose weights to
    # (in, out), zero-pad hidden/output lanes, zero-pad batch rows.
    x_p = jnp.zeros((Bp, D), jnp.float32).at[:B, :].set(x)
    w1_p = jnp.zeros((D, Hp), jnp.float32).at[:, :H].set(w1.T)
    b1_p = jnp.zeros((1, Hp), jnp.float32).at[0, :H].set(b1)
    w2_p = jnp.zeros((Hp, Np), jnp.float32).at[:H, :N].set(w2.T)
    b2_p = jnp.zeros((1, Np), jnp.float32).at[0, :N].set(b2)
    # (Padded hidden columns of w1_p/b1_p are zero and the matching rows of
    #  w2_p are zero, so padding never changes the math.)

    grid = (Bp // TB,)

    fr_p, x0_p = pl.pallas_call(
        lnp_kernel,
        out_shape=(
            jax.ShapeDtypeStruct((Bp, Np), jnp.float32),   # firing_rate (padded)
            jax.ShapeDtypeStruct((Bp, Hp), jnp.float32),   # x_0 (padded)
        ),
        grid=grid,
        in_specs=[
            pl.BlockSpec((TB, D), lambda i: (i, 0)),     # x tile, streamed
            pl.BlockSpec((D, Hp), lambda i: (0, 0)),     # w1: VMEM-resident
            pl.BlockSpec((1, Hp), lambda i: (0, 0)),     # b1: VMEM-resident
            pl.BlockSpec((Hp, Np), lambda i: (0, 0)),    # w2: VMEM-resident
            pl.BlockSpec((1, Np), lambda i: (0, 0)),     # b2: VMEM-resident
        ],
        out_specs=(
            pl.BlockSpec((TB, Np), lambda i: (i, 0)),
            pl.BlockSpec((TB, Hp), lambda i: (i, 0)),
        ),
        compiler_params=pltpu.CompilerParams(
            dimension_semantics=("parallel",),           # megacore on v7x
        ),
    )(x_p, w1_p, b1_p, w2_p, b2_p)

    # Slice the zero-padding back off (cheap XLA slice, outside the kernel).
    return fr_p[:B, :N], x0_p[:B, :H]


def init_params(key, input_dim, n_neurons, hidden=10):
    """Deterministic init mimicking nn.Linear's U(-1/sqrt(fan_in), 1/sqrt(fan_in))."""
    k1, k2, k3, k4 = jax.random.split(key, 4)
    lim1 = 1.0 / jnp.sqrt(float(input_dim))
    lim2 = 1.0 / jnp.sqrt(float(hidden))
    # PyTorch layout: (out, in).
    w1 = jax.random.uniform(k1, (hidden, input_dim), jnp.float32, -lim1, lim1)
    b1 = jax.random.uniform(k2, (hidden,), jnp.float32, -lim1, lim1)
    w2 = jax.random.uniform(k3, (n_neurons, hidden), jnp.float32, -lim2, lim2)
    b2 = jax.random.uniform(k4, (n_neurons,), jnp.float32, -lim2, lim2)
    return w1, b1, w2, b2


if __name__ == "__main__":
    B, input_dim, n_neurons, hidden = 8, 32, 16, 10

    key = jax.random.PRNGKey(0)
    kx, kp = jax.random.split(key)
    x = jax.random.normal(kx, (B, input_dim), jnp.float32)
    w1, b1, w2, b2 = init_params(kp, input_dim, n_neurons, hidden)

    fr, x0 = lnp_forward(x, w1, b1, w2, b2)
    jax.block_until_ready((fr, x0))

    # Pure-JAX reference (same math as the PyTorch forward).
    x0_ref = x @ w1.T + b1
    fr_ref = jnp.exp(x0_ref @ w2.T + b2)
    assert x0.shape == (B, hidden) and fr.shape == (B, n_neurons)
    assert jnp.allclose(x0, x0_ref, atol=1e-5, rtol=1e-5)
    assert jnp.allclose(fr, fr_ref, atol=1e-5, rtol=1e-5)

    print("KERNEL_OK")
</pallas_src>

<mosaic_0001>
module attributes {stable_mosaic.version = 11 : i64} {
  func.func @lnp_kernel(%arg0: i32, %arg1: memref<8x32xf32, #tpu.memory_space<vmem>>, %arg2: memref<32x128xf32, #tpu.memory_space<vmem>>, %arg3: memref<1x128xf32, #tpu.memory_space<vmem>>, %arg4: memref<128x128xf32, #tpu.memory_space<vmem>>, %arg5: memref<1x128xf32, #tpu.memory_space<vmem>>, %arg6: memref<8x128xf32, #tpu.memory_space<vmem>>, %arg7: memref<8x128xf32, #tpu.memory_space<vmem>>) attributes {dimension_semantics = [#tpu.dimension_semantics<parallel>], iteration_bounds = array<i64: 1>, scalar_prefetch = 0 : i64, scratch_operands = 0 : i64, tpu.core_type = #tpu.core_type<tc>, window_params = [{transform_indices = @transform_0, window_bounds = array<i64: 8, 32>}, {pipeline_mode = #tpu.pipeline_mode<synchronous>, transform_indices = @transform_1, window_bounds = array<i64: 32, 128>}, {pipeline_mode = #tpu.pipeline_mode<synchronous>, transform_indices = @transform_2, window_bounds = array<i64: 1, 128>}, {pipeline_mode = #tpu.pipeline_mode<synchronous>, transform_indices = @transform_3, window_bounds = array<i64: 128, 128>}, {pipeline_mode = #tpu.pipeline_mode<synchronous>, transform_indices = @transform_4, window_bounds = array<i64: 1, 128>}, {transform_indices = @transform_5, window_bounds = array<i64: 8, 128>}, {transform_indices = @transform_6, window_bounds = array<i64: 8, 128>}]} {
    %c0 = arith.constant 0 : index
    %c0_0 = arith.constant 0 : index
    %0 = vector.load %arg1[%c0, %c0_0] : memref<8x32xf32, #tpu.memory_space<vmem>>, vector<8x32xf32>
    %c0_1 = arith.constant 0 : index
    %c0_2 = arith.constant 0 : index
    %1 = vector.load %arg2[%c0_1, %c0_2] : memref<32x128xf32, #tpu.memory_space<vmem>>, vector<32x128xf32>
    %cst = arith.constant dense<0.000000e+00> : vector<8x128xf32>
    %2 = tpu.matmul %0, %1, %cst {dimension_numbers = #tpu.dot_dimension_numbers<[1], [0], [0], [1], [0, 0, 1, 1], [], []>} : vector<8x32xf32>, vector<32x128xf32>, vector<8x128xf32> -> vector<8x128xf32>
    %c0_3 = arith.constant 0 : index
    %c0_4 = arith.constant 0 : index
    %3 = vector.load %arg3[%c0_3, %c0_4] : memref<1x128xf32, #tpu.memory_space<vmem>>, vector<1x128xf32>
    %4 = vector.broadcast %3 : vector<1x128xf32> to vector<8x128xf32>
    %5 = arith.addf %2, %4 : vector<8x128xf32>
    %c0_5 = arith.constant 0 : index
    %c0_6 = arith.constant 0 : index
    %6 = vector.load %arg7[%c0_5, %c0_6] : memref<8x128xf32, #tpu.memory_space<vmem>>, vector<8x128xf32>
    tpu.vector_store %arg7[%c0_5, %c0_6], %5 {strides = array<i32>} : memref<8x128xf32, #tpu.memory_space<vmem>>, vector<8x128xf32>,
    %c0_7 = arith.constant 0 : index
    %c0_8 = arith.constant 0 : index
    %7 = vector.load %arg4[%c0_7, %c0_8] : memref<128x128xf32, #tpu.memory_space<vmem>>, vector<128x128xf32>
    %cst_9 = arith.constant dense<0.000000e+00> : vector<8x128xf32>
    %8 = tpu.matmul %5, %7, %cst_9 {dimension_numbers = #tpu.dot_dimension_numbers<[1], [0], [0], [1], [0, 0, 1, 1], [], []>} : vector<8x128xf32>, vector<128x128xf32>, vector<8x128xf32> -> vector<8x128xf32>
    %c0_10 = arith.constant 0 : index
    %c0_11 = arith.constant 0 : index
    %9 = vector.load %arg5[%c0_10, %c0_11] : memref<1x128xf32, #tpu.memory_space<vmem>>, vector<1x128xf32>
    %10 = vector.broadcast %9 : vector<1x128xf32> to vector<8x128xf32>
    %11 = arith.addf %8, %10 : vector<8x128xf32>
    %12 = math.exp %11 : vector<8x128xf32>
    %c0_12 = arith.constant 0 : index
    %c0_13 = arith.constant 0 : index
    %13 = vector.load %arg6[%c0_12, %c0_13] : memref<8x128xf32, #tpu.memory_space<vmem>>, vector<8x128xf32>
    tpu.vector_store %arg6[%c0_12, %c0_13], %12 {strides = array<i32>} : memref<8x128xf32, #tpu.memory_space<vmem>>, vector<8x128xf32>,
    return
  }
  func.func @transform_0(%arg0: i32) -> (i32, i32) {
    %c0_i32 = arith.constant 0 : i32
    %c0_i32_0 = arith.constant 0 : i32
    return %arg0, %c0_i32 : i32, i32
  }
  func.func @transform_1(%arg0: i32) -> (i32, i32) {
    %c0_i32 = arith.constant 0 : i32
    %c0_i32_0 = arith.constant 0 : i32
    %c0_i32_1 = arith.constant 0 : i32
    return %c0_i32, %c0_i32_0 : i32, i32
  }
  func.func @transform_2(%arg0: i32) -> (i32, i32) {
    %c0_i32 = arith.constant 0 : i32
    %c0_i32_0 = arith.constant 0 : i32
    %c0_i32_1 = arith.constant 0 : i32
    return %c0_i32, %c0_i32_0 : i32, i32
  }
  func.func @transform_3(%arg0: i32) -> (i32, i32) {
    %c0_i32 = arith.constant 0 : i32
    %c0_i32_0 = arith.constant 0 : i32
    %c0_i32_1 = arith.constant 0 : i32
    return %c0_i32, %c0_i32_0 : i32, i32
  }
  func.func @transform_4(%arg0: i32) -> (i32, i32) {
    %c0_i32 = arith.constant 0 : i32
    %c0_i32_0 = arith.constant 0 : i32
    %c0_i32_1 = arith.constant 0 : i32
    return %c0_i32, %c0_i32_0 : i32, i32
  }
  func.func @transform_5(%arg0: i32) -> (i32, i32) {
    %c0_i32 = arith.constant 0 : i32
    %c0_i32_0 = arith.constant 0 : i32
    return %arg0, %c0_i32 : i32, i32
  }
  func.func @transform_6(%arg0: i32) -> (i32, i32) {
    %c0_i32 = arith.constant 0 : i32
    %c0_i32_0 = arith.constant 0 : i32
    return %arg0, %c0_i32 : i32, i32
  }
}

</mosaic_0001>

<bundles_post_ra>
// kernel: lnp_forward.1
= control target key start
LH: loop header
LB: loop body
LE: loop exit
PB: predicated region body
PF: predicated region fallthrough
CT: control target
= control target key end

     0   :  { %12 = vsyncpa [#allocation3], 0  ;;  %v356_v1 = vmov 0.0   ;;  %vm357_vm0 = vmmov 0   ;;  %vm36_vm1 = vcmask 261120   ;;  %s494_s0 = inlined_call_operand.vmem [shape: f32[8,32], index: 0, kind: input, shape index: {}]   ;;  %s495_s1 = inlined_call_operand.vmem [shape: f32[32,128], index: 1, kind: input, shape index: {}]   ;;  %s496_s2 = inlined_call_operand.vmem [shape: f32[1,128], index: 2, kind: input, shape index: {}]   ;;  %s497_s3 = inlined_call_operand.vmem [shape: f32[128,128], index: 3, kind: input, shape index: {}]   ;;  %s498_s4 = inlined_call_operand.vmem [shape: f32[1,128], index: 4, kind: input, shape index: {}]   ;;  %s499_s5 = inlined_call_operand.hbm [shape: f32[8,128], index: 5, kind: output, shape index: {0}]   ;;  %s500_s6 = inlined_call_operand.hbm [shape: f32[8,128], index: 6, kind: output, shape index: {1}]  }
   0x1   :  { %v28_v0 = vld [vmem:[%s495_s1 + $0x18] sm:$0xff]  ;;  %260 = vmatprep.subr.mxu0 %v356_v1  ;;  %v27_v2 = vld [vmem:[%s495_s1 + $0x10] sm:$0xff]  ;;  %268 = vmatprep.mubr.msk.f32.mxu0 %vm357_vm0, %v356_v1  ;;  %v26_v5 = vld [vmem:[%s495_s1 + $0x8] sm:$0xff] }
   0x2   :  { %v126_v3 = vld [vmem:[%s497_s3 + $0x78] sm:$0xff]  ;;  %261 = vmatpush3.msra.mxu0 %v28_v0  ;;  %271 = vmatprep.subr.mxu1 %v356_v1  ;;  %v125_v4 = vld [vmem:[%s497_s3 + $0x70] sm:$0xff]  ;;  %v124_v6 = vld [vmem:[%s497_s3 + $0x68] sm:$0xff] }
   0x3   :  { %262 = vmatprep.subr.mxu0 %v356_v1  ;;  %272 = vmatpush3.msra.mxu1 %v126_v3  ;;  %v25_v7 = vld [vmem:[%s495_s1] sm:$0xff] }
   0x4   :  { %263 = vmatpush3.msra.mxu0 %v27_v2  ;;  %273 = vmatprep.subr.mxu1 %v356_v1  ;;  %v24_v8 = vld [vmem:[%s494_s0] sm:$0xff] }
   0x5   :  { %264 = vmatprep.subr.mxu0 %v356_v1  ;;  %274 = vmatpush3.msra.mxu1 %v125_v4  ;;  %v123_v9 = vld [vmem:[%s497_s3 + $0x60] sm:$0xff] }
   0x6   :  { %265 = vmatpush3.msra.mxu0 %v26_v5  ;;  %275 = vmatprep.subr.mxu1 %v356_v1 }
   0x7   :  { %13 = vsyncpa [#allocation5], 0  ;;  %266 = vmatprep.subr.mxu0 %v356_v1  ;;  %276 = vmatpush3.msra.mxu1 %v124_v6  ;;  %v122_v10 = vld [vmem:[%s497_s3 + $0x58] sm:$0xff]  ;;  %v121_v11 = vld [vmem:[%s497_s3 + $0x50] sm:$0xff]  ;;  %s358_s1 = smov [#allocation4]  }
   0x8   :  { %267 = vmatpush3.msra.mxu0 %v25_v7  ;;  %277 = vmatprep.subr.mxu1 %v356_v1  ;;  %v120_v12 = vld [vmem:[%s497_s3 + $0x48] sm:$0xff]  ;;  %v119_v13 = vld [vmem:[%s497_s3 + $0x40] sm:$0xff]  ;;  %v118_v14 = vld [vmem:[%s497_s3 + $0x38] sm:$0xff]  ;;  %s223_s15 = sshll.u32 %s358_s1, 4  ;;  %s224_s15 = int_to_ptr.vmem [resolvable:$true] %s223_s15 }
   0x9   :  { %269 = vmatmul.mubr.msk.f32.vlgmr.msra.gmra.mxu0 %vm36_vm1, %v24_v8  ;;  %278 = vmatpush3.msra.mxu1 %v123_v9  ;;  %v117_v15 = vld [vmem:[%s497_s3 + $0x30] sm:$0xff]  ;;  %v116_v16 = vld [vmem:[%s497_s3 + $0x28] sm:$0xff]  ;;  %v115_v17 = vld [vmem:[%s497_s3 + $0x20] sm:$0xff]  ;;  %s312_s0 = scalar_lea.vmem %s224_s15, 128  ;;  %p317_p1 = scmp.lt.s32.totalorder %s224_s15, %s224_s15 }
   0xa   :  { %279 = vmatprep.subr.mxu1 %v356_v1  ;;  %303 = vmatprep.mubr.msk.f32.mxu1 %vm357_vm0, %v356_v1  ;;  %v114_v18 = vld [vmem:[%s497_s3 + $0x18] sm:$0xff]  ;;  %v113_v19 = vld [vmem:[%s497_s3 + $0x10] sm:$0xff]  ;;  %v112_v20 = vld [vmem:[%s497_s3 + $0x8] sm:$0xff]  ;;  %p313_p0 = scmp.ne.s32.totalorder %s224_s15, %s312_s0  ;;  %p318_p2 = scmp.lt.s32.totalorder %s312_s0, %s312_s0 }
   0xb   :  { %280 = vmatpush3.msra.mxu1 %v122_v10  ;;  %v111_v21 = vld [vmem:[%s497_s3] sm:$0xff] }
   0xc   :  { %281 = vmatprep.subr.mxu1 %v356_v1  ;;  %v235_v22 = vld [vmem:[%s496_s2] ss:$0 sm:$0xff]  ;;  %p319_p3 = por %p318_p2, %p317_p1 }
   0xd   :  { %282 = vmatpush3.msra.mxu1 %v121_v11 }
   0xe   :  { %283 = vmatprep.subr.mxu1 %v356_v1  ;;  %p320_p4 = pnand %p319_p3, %p313_p0 }
   0xf   :  { %284 = vmatpush3.msra.mxu1 %v120_v12 }
  0x10   :  { %285 = vmatprep.subr.mxu1 %v356_v1 }
  0x11   :  { %286 = vmatpush3.msra.mxu1 %v119_v13 }
  0x12   :  { %287 = vmatprep.subr.mxu1 %v356_v1 }
  0x13   :  { %288 = vmatpush3.msra.mxu1 %v118_v14 }
  0x14   :  { %289 = vmatprep.subr.mxu1 %v356_v1 }
  0x15   :  { %290 = vmatpush3.msra.mxu1 %v117_v15 }
  0x16   :  { %291 = vmatprep.subr.mxu1 %v356_v1 }
  0x17   :  { %292 = vmatpush3.msra.mxu1 %v116_v16 }
  0x18   :  { %293 = vmatprep.subr.mxu1 %v356_v1 }
  0x19   :  { %294 = vmatpush3.msra.mxu1 %v115_v17 }
  0x1a   :  { %295 = vmatprep.subr.mxu1 %v356_v1 }
  0x1b   :  { %296 = vmatpush3.msra.mxu1 %v114_v18 }
  0x1c   :  { %297 = vmatprep.subr.mxu1 %v356_v1 }
  0x1d   :  { %298 = vmatpush3.msra.mxu1 %v113_v19 }
  0x1e   :  { %299 = vmatprep.subr.mxu1 %v356_v1 }
  0x1f   :  { %300 = vmatpush3.msra.mxu1 %v112_v20 }
  0x20   :  { %301 = vmatprep.subr.mxu1 %v356_v1 }
  0x21   :  { %302 = vmatpush3.msra.mxu1 %v111_v21 }
  0xc9   :  { %v106_v23 = vpop.f32.mrf.mxu0 }
  0xca   :  { %v107_v24 = vadd.f32 %v235_v22, %v106_v23 }
  0xcb   :  { %v270_v25 = vpop.f32.mrf.mxu0 }
  0xcc   :  { %110 = vst [vmem:[#allocation4] sm:$0xff] %v107_v24  ;;  %304 = vmatmul.mubr.f32.vlgmr.msra.gmra.mxu1 %v107_v24 }
  0xcd   :  { %323 = shalt.err (!%p320_p4)
}
  0xce   :  { %226 = dma.vmem_to_hbm [thread:$0]  %s224_s15, 128, %s500_s6, [#allocation5]   ;;  %v237_v26 = vld [vmem:[%s498_s4] ss:$0 sm:$0xff] }
  0xcf   :  { %s359_s18 = smov [#allocation2]  }
  0xd0   :  { %s213_s19 = sshll.u32 %s359_s18, 4  ;;  %s214_s19 = int_to_ptr.vmem [resolvable:$true] %s213_s19 }
  0xd1   :  { %s332_s20 = scalar_lea.vmem %s214_s19, 128  ;;  %p337_p6 = scmp.lt.s32.totalorder %s214_s19, %s214_s19 }
  0xd2   :  { %p333_p5 = scmp.ne.s32.totalorder %s214_s19, %s332_s20  ;;  %p338_p7 = scmp.lt.s32.totalorder %s332_s20, %s332_s20 }
  0xd4   :  { %p339_p8 = por %p338_p7, %p337_p6 }
  0xd6   :  { %p340_p9 = pnand %p339_p8, %p333_p5 }
 0x18c   :  { %v200_v27 = vpop.f32.mrf.mxu1 }
 0x18d   :  { %v201_v28 = vadd.f32 %v237_v26, %v200_v27 }
 0x18e   :  { %v305_v29 = vpop.f32.mrf.mxu1 }
 0x18f   :  { %v204_v30 = vmul.f32 1.442695, %v201_v28 }
 0x191   :  { %310 = vpow2.f32 %v204_v30 }
 0x19e   :  { %v311_v31 = vpop.eup %310 }
 0x19f   :  { %206 = vst [vmem:[#allocation2] sm:$0xff] %v311_v31 }
 0x1a0   :  { %343 = shalt.err (!%p340_p9)
}
 0x1a1   :  { %216 = dma.vmem_to_hbm [thread:$0]  %s214_s19, 128, %s499_s5, [#allocation3]  }
 0x1a2   :  { %352 = dma.done.wait [#allocation3], 128  }
 0x1a3   :  { %353 = vsyncadd [#allocation3], 4294967168 }
 0x1a4   :  { %354 = dma.done.wait [#allocation5], 128  }
 0x1a5   :  { %355 = vsyncadd [#allocation5], 4294967168 }
 0x1a6   :  { %233 = vsyncpa [#allocation3], 1 }
 0x1a7   :  { %234 = vsyncpa [#allocation5], 1 }

</bundles_post_ra>
